<compile_context>
chip_gen: v7x
topology: tpu7x:2x2x1
jax: 0.10.0
libtpu: 0.0.40
codegen_flags: <defaults>
</compile_context>

<pallas_src>
import functools

import jax
import jax.numpy as jnp
from jax import lax
from jax.experimental import pallas as pl
from jax.experimental.pallas import tpu as pltpu


# ---------------------------------------------------------------------------
# tiling helpers
# ---------------------------------------------------------------------------
_TB_MAX = 256   # anchor-row tile (MXU M dim), multiple of 8
_TC_MAX = 512   # contrast / queue tile (MXU N dim), multiple of 128


def _round_up(x, m):
    return (x + m - 1) // m * m


def _row_tiling(b):
    b_pad = _round_up(max(b, 1), 8)
    if b_pad <= _TB_MAX:
        return b_pad, b_pad
    return _round_up(b, _TB_MAX), _TB_MAX


def _col_tiling(n):
    n_pad = _round_up(max(n, 1), 128)
    if n_pad <= _TC_MAX:
        return n_pad, n_pad
    return _round_up(n, _TC_MAX), _TC_MAX


# ---------------------------------------------------------------------------
# Kernels
# ---------------------------------------------------------------------------
def _supcon_mask_kernel(anch_ref, feat_ref, mask_ref, out_ref,
                        m_sc, l_sc, summ_sc, smadc_sc, *,
                        inv_t, loss_scale, b_real, n_real, tb, tn):
    """Supervised-contrastive branch (mask is not None), online over N tiles."""
    i = pl.program_id(0)          # anchor-row block ("parallel")
    j = pl.program_id(1)          # contrast block (reduction axis, last)
    nj = pl.num_programs(1)

    @pl.when(j == 0)
    def _init():
        m_sc[...] = jnp.full_like(m_sc, -1e30)
        l_sc[...] = jnp.zeros_like(l_sc)
        summ_sc[...] = jnp.zeros_like(summ_sc)
        smadc_sc[...] = jnp.zeros_like(smadc_sc)

    # [tb, tn] anchor . contrast, contracting the shared C axis of both operands
    # (no transpose materialized); bf16 in, f32 accumulate on the MXU.
    adc = lax.dot_general(
        anch_ref[...], feat_ref[...],
        dimension_numbers=(((1,), (1,)), ((), ())),
        preferred_element_type=jnp.float32) * inv_t

    row_g = lax.broadcasted_iota(jnp.int32, (tb, tn), 0) + i * tb
    col_g = lax.broadcasted_iota(jnp.int32, (tb, tn), 1) + j * tn
    valid = col_g < n_real                      # drop N-padding columns
    keep = valid & (row_g != col_g)             # logits_mask (self excluded)
    keep_f = keep.astype(jnp.float32)

    # running row-max over all valid columns (matches torch: max over full row)
    tile_max = jnp.max(jnp.where(valid, adc, -1e30), axis=1, keepdims=True)
    m_prev = m_sc[...]
    m_new = jnp.maximum(m_prev, tile_max)

    # running denominator: sum_j exp(adc - max) over non-self valid columns
    p_sum = jnp.sum(jnp.exp(jnp.where(keep, adc, -1e30) - m_new),
                    axis=1, keepdims=True)
    l_sc[...] = l_sc[...] * jnp.exp(m_prev - m_new) + p_sum
    m_sc[...] = m_new

    # positives statistics (self excluded): running sum(m) and sum(m * adc)
    pos = mask_ref[...] * keep_f
    summ_sc[...] = summ_sc[...] + jnp.sum(pos, axis=1, keepdims=True)
    smadc_sc[...] = smadc_sc[...] + jnp.sum(pos * adc, axis=1, keepdims=True)

    @pl.when(j == nj - 1)
    def _finalize():
        s_m = summ_sc[...]
        log_den = jnp.log(l_sc[...] + 1e-12)
        # sum_j m*log_prob = sum_j m*adc - sum(m) * (max + log(denom))
        num = smadc_sc[...] - s_m * (m_sc[...] + log_den)
        mean_log_prob_pos = num * pl.reciprocal(s_m, approx=True)
        row_loss = loss_scale * mean_log_prob_pos      # -(t/bt)/B per real row
        rows = lax.broadcasted_iota(jnp.int32, row_loss.shape, 0) + i * tb
        out_ref[...] = jnp.where(rows < b_real, row_loss, 0.0)


def _infonce_kernel(q_ref, k_ref, queue_ref, out_ref,
                    m_sc, l_sc, lpos_sc, *,
                    inv_t, inv_b, b_real, k_real, tb, tk):
    """MoCo-style branch (mask is None): CE vs label 0, online LSE over K tiles."""
    i = pl.program_id(0)
    j = pl.program_id(1)
    nj = pl.num_programs(1)

    @pl.when(j == 0)
    def _init():
        lpos = jnp.sum(q_ref[...].astype(jnp.float32) *
                       k_ref[...].astype(jnp.float32),
                       axis=1, keepdims=True) * inv_t
        lpos_sc[...] = lpos
        m_sc[...] = lpos                    # logsumexp seeded with the positive
        l_sc[...] = jnp.ones_like(lpos)     # exp(lpos - lpos) == 1

    l_neg = lax.dot_general(
        q_ref[...], queue_ref[...],
        dimension_numbers=(((1,), (1,)), ((), ())),
        preferred_element_type=jnp.float32) * inv_t
    col_g = lax.broadcasted_iota(jnp.int32, (tb, tk), 1) + j * tk
    l_neg = jnp.where(col_g < k_real, l_neg, -1e30)    # drop K-padding columns

    m_prev = m_sc[...]
    m_new = jnp.maximum(m_prev, jnp.max(l_neg, axis=1, keepdims=True))
    p_sum = jnp.sum(jnp.exp(l_neg - m_new), axis=1, keepdims=True)
    l_sc[...] = l_sc[...] * jnp.exp(m_prev - m_new) + p_sum
    m_sc[...] = m_new

    @pl.when(j == nj - 1)
    def _finalize():
        lse = m_sc[...] + jnp.log(l_sc[...])
        row_loss = (lse - lpos_sc[...]) * inv_b
        rows = lax.broadcasted_iota(jnp.int32, row_loss.shape, 0) + i * tb
        out_ref[...] = jnp.where(rows < b_real, row_loss, 0.0)


# ---------------------------------------------------------------------------
# Wrapper (module equivalent)
# ---------------------------------------------------------------------------
class SupConLoss:
    def __init__(self, temperature=0.07, base_temperature=0.07):
        self.temperature = float(temperature)
        self.base_temperature = float(base_temperature)

    def __call__(self, features, mask=None, batch_size=-1):
        if batch_size <= 0:
            raise ValueError("batch_size must be a positive static int")
        B = int(batch_size)
        if mask is not None:
            return self._supcon(features, mask, B)
        return self._infonce(features, B)

    # -- supervised contrastive branch (mask is not None) -------------------
    def _supcon(self, features, mask, B):
        N, C = features.shape
        b_pad, tb = _row_tiling(B)
        n_pad, tn = _col_tiling(N)

        feats_bf = features.astype(jnp.bfloat16)              # halves HBM traffic
        anchors = jnp.pad(feats_bf[:B], ((0, b_pad - B), (0, 0)))
        contrast = jnp.pad(feats_bf, ((0, n_pad - N), (0, 0)))
        # mask stays f32 for generality (spec allows arbitrary float masks)
        mask_p = jnp.pad(mask.astype(jnp.float32),
                         ((0, b_pad - B), (0, n_pad - N)))

        kernel = functools.partial(
            _supcon_mask_kernel,
            inv_t=1.0 / self.temperature,
            loss_scale=-(self.temperature / self.base_temperature) / B,
            b_real=B, n_real=N, tb=tb, tn=tn)

        grid = (b_pad // tb, n_pad // tn)
        per_row = pl.pallas_call(
            kernel,
            out_shape=jax.ShapeDtypeStruct((b_pad, 1), jnp.float32),
            grid_spec=pltpu.PrefetchScalarGridSpec(
                num_scalar_prefetch=0,
                grid=grid,
                in_specs=[
                    pl.BlockSpec((tb, C), lambda i, j: (i, 0)),   # anchors
                    pl.BlockSpec((tn, C), lambda i, j: (j, 0)),   # contrast tile
                    pl.BlockSpec((tb, tn), lambda i, j: (i, j)),  # mask tile
                ],
                out_specs=pl.BlockSpec((tb, 1), lambda i, j: (i, 0)),
                scratch_shapes=[pltpu.VMEM((tb, 1), jnp.float32)] * 4),
            compiler_params=pltpu.CompilerParams(
                dimension_semantics=("parallel", "arbitrary"),
                vmem_limit_bytes=32 * 1024 * 1024),
            cost_estimate=pl.CostEstimate(
                flops=2 * b_pad * n_pad * C,
                transcendentals=b_pad * n_pad,
                bytes_accessed=(b_pad * C + n_pad * C) * 2
                               + b_pad * n_pad * 4 + b_pad * 4),
        )(anchors, contrast, mask_p)
        return jnp.sum(per_row)        # padded rows contribute exactly 0

    # -- MoCo / InfoNCE branch (mask is None) --------------------------------
    def _infonce(self, features, B):
        total, C = features.shape
        K = total - 2 * B
        if K <= 0:
            raise ValueError("InfoNCE branch needs a non-empty queue")
        b_pad, tb = _row_tiling(B)
        k_pad, tk = _col_tiling(K)

        feats_bf = features.astype(jnp.bfloat16)
        q = jnp.pad(feats_bf[:B], ((0, b_pad - B), (0, 0)))
        kpos = jnp.pad(feats_bf[B:2 * B], ((0, b_pad - B), (0, 0)))
        queue = jnp.pad(feats_bf[2 * B:], ((0, k_pad - K), (0, 0)))

        kernel = functools.partial(
            _infonce_kernel,
            inv_t=1.0 / self.temperature,
            inv_b=1.0 / B,
            b_real=B, k_real=K, tb=tb, tk=tk)

        grid = (b_pad // tb, k_pad // tk)
        per_row = pl.pallas_call(
            kernel,
            out_shape=jax.ShapeDtypeStruct((b_pad, 1), jnp.float32),
            grid_spec=pltpu.PrefetchScalarGridSpec(
                num_scalar_prefetch=0,
                grid=grid,
                in_specs=[
                    pl.BlockSpec((tb, C), lambda i, j: (i, 0)),   # q
                    pl.BlockSpec((tb, C), lambda i, j: (i, 0)),   # k
                    pl.BlockSpec((tk, C), lambda i, j: (j, 0)),   # queue tile
                ],
                out_specs=pl.BlockSpec((tb, 1), lambda i, j: (i, 0)),
                scratch_shapes=[pltpu.VMEM((tb, 1), jnp.float32)] * 3),
            compiler_params=pltpu.CompilerParams(
                dimension_semantics=("parallel", "arbitrary"),
                vmem_limit_bytes=32 * 1024 * 1024),
            cost_estimate=pl.CostEstimate(
                flops=2 * b_pad * k_pad * C + 2 * b_pad * C,
                transcendentals=b_pad * k_pad,
                bytes_accessed=(2 * b_pad * C + k_pad * C) * 2 + b_pad * 4),
        )(q, kpos, queue)
        return jnp.sum(per_row)


# ---------------------------------------------------------------------------
# Pure-JAX references (bf16-cast to match the MXU inputs)
# ---------------------------------------------------------------------------
def _ref_supcon_mask(features, mask, B, t, bt):
    f = features.astype(jnp.bfloat16).astype(jnp.float32)
    N = f.shape[0]
    adc = (f[:B] @ f.T) / t
    logits = adc - jnp.max(adc, axis=1, keepdims=True)
    logits_mask = jnp.ones((B, N)).at[jnp.arange(B), jnp.arange(B)].set(0.0)
    m = mask * logits_mask
    exp_logits = jnp.exp(logits) * logits_mask
    log_prob = logits - jnp.log(exp_logits.sum(1, keepdims=True) + 1e-12)
    mean_log_prob_pos = (m * log_prob).sum(1) / m.sum(1)
    return jnp.mean(-(t / bt) * mean_log_prob_pos)


def _ref_infonce(features, B, t):
    f = features.astype(jnp.bfloat16).astype(jnp.float32)
    q, k, queue = f[:B], f[B:2 * B], f[2 * B:]
    l_pos = jnp.sum(q * k, axis=1, keepdims=True)
    l_neg = q @ queue.T
    logits = jnp.concatenate([l_pos, l_neg], axis=1) / t
    lse = jax.scipy.special.logsumexp(logits, axis=1)
    return jnp.mean(lse - logits[:, 0])


# ---------------------------------------------------------------------------
if __name__ == "__main__":
    key = jax.random.PRNGKey(0)
    k1, k2 = jax.random.split(key)

    B, C = 8, 128
    N = 1000          # total contrast samples (mask branch) -> 2 tiles + padding
    K = 1000          # queue size (InfoNCE branch)           -> 2 tiles + padding
    t = 0.07

    loss_fn = SupConLoss(temperature=t, base_temperature=t)

    # --- supervised-contrastive (mask) branch ------------------------------
    feats = jax.random.normal(k1, (N, C), dtype=jnp.float32)
    feats = feats / jnp.linalg.norm(feats, axis=1, keepdims=True)
    labels = jnp.arange(N, dtype=jnp.int32) % 4
    mask = (labels[:B, None] == labels[None, :]).astype(jnp.float32)  # [B, N]

    loss_mask = loss_fn(feats, mask=mask, batch_size=B)
    jax.block_until_ready(loss_mask)
    ref_mask = _ref_supcon_mask(feats, mask, B, t, t)
    assert jnp.allclose(loss_mask, ref_mask, rtol=5e-3, atol=5e-3), (
        loss_mask, ref_mask)

    # --- InfoNCE (mask=None) branch -----------------------------------------
    feats2 = jax.random.normal(k2, (2 * B + K, C), dtype=jnp.float32)
    feats2 = feats2 / jnp.linalg.norm(feats2, axis=1, keepdims=True)
    loss_nce = loss_fn(feats2, mask=None, batch_size=B)
    jax.block_until_ready(loss_nce)
    ref_nce = _ref_infonce(feats2, B, t)
    assert jnp.allclose(loss_nce, ref_nce, rtol=5e-3, atol=5e-3), (
        loss_nce, ref_nce)

    print("KERNEL_OK")
</pallas_src>

<mosaic_0001>
module attributes {stable_mosaic.version = 11 : i64} {
  func.func @_supcon_mask_kernel(%arg0: i32, %arg1: i32, %arg2: memref<8x128xbf16, #tpu.memory_space<vmem>>, %arg3: memref<512x128xbf16, #tpu.memory_space<vmem>>, %arg4: memref<8x512xf32, #tpu.memory_space<vmem>>, %arg5: memref<8x1xf32, #tpu.memory_space<vmem>>, %arg6: memref<8x1xf32, #tpu.memory_space<vmem>>, %arg7: memref<8x1xf32, #tpu.memory_space<vmem>>, %arg8: memref<8x1xf32, #tpu.memory_space<vmem>>, %arg9: memref<8x1xf32, #tpu.memory_space<vmem>>) attributes {dimension_semantics = [#tpu.dimension_semantics<parallel>, #tpu.dimension_semantics<arbitrary>], iteration_bounds = array<i64: 1, 2>, scalar_prefetch = 0 : i64, scratch_operands = 4 : i64, tpu.core_type = #tpu.core_type<tc>, window_params = [{transform_indices = @transform_0, window_bounds = array<i64: 8, 128>}, {transform_indices = @transform_1, window_bounds = array<i64: 512, 128>}, {transform_indices = @transform_2, window_bounds = array<i64: 8, 512>}, {transform_indices = @transform_3, window_bounds = array<i64: 8, 1>}]} {
    %c0_i32 = arith.constant 0 : i32
    %0 = arith.cmpi eq, %arg1, %c0_i32 : i32
    %1 = arith.extui %0 : i1 to i32
    %c0_i32_0 = arith.constant 0 : i32
    %2 = arith.cmpi ne, %1, %c0_i32_0 : i32
    scf.if %2 {
      %cst_30 = arith.constant -1.000000e+30 : f32
      %58 = vector.broadcast %cst_30 : f32 to vector<8x1xf32>
      %c0_31 = arith.constant 0 : index
      %c0_32 = arith.constant 0 : index
      %59 = vector.load %arg6[%c0_31, %c0_32] : memref<8x1xf32, #tpu.memory_space<vmem>>, vector<8x1xf32>
      tpu.vector_store %arg6[%c0_31, %c0_32], %58 {strides = array<i32>} : memref<8x1xf32, #tpu.memory_space<vmem>>, vector<8x1xf32>,
      %cst_33 = arith.constant 0.000000e+00 : f32
      %60 = vector.broadcast %cst_33 : f32 to vector<8x1xf32>
      %c0_34 = arith.constant 0 : index
      %c0_35 = arith.constant 0 : index
      %61 = vector.load %arg7[%c0_34, %c0_35] : memref<8x1xf32, #tpu.memory_space<vmem>>, vector<8x1xf32>
      tpu.vector_store %arg7[%c0_34, %c0_35], %60 {strides = array<i32>} : memref<8x1xf32, #tpu.memory_space<vmem>>, vector<8x1xf32>,
      %cst_36 = arith.constant 0.000000e+00 : f32
      %62 = vector.broadcast %cst_36 : f32 to vector<8x1xf32>
      %c0_37 = arith.constant 0 : index
      %c0_38 = arith.constant 0 : index
      %63 = vector.load %arg8[%c0_37, %c0_38] : memref<8x1xf32, #tpu.memory_space<vmem>>, vector<8x1xf32>
      tpu.vector_store %arg8[%c0_37, %c0_38], %62 {strides = array<i32>} : memref<8x1xf32, #tpu.memory_space<vmem>>, vector<8x1xf32>,
      %cst_39 = arith.constant 0.000000e+00 : f32
      %64 = vector.broadcast %cst_39 : f32 to vector<8x1xf32>
      %c0_40 = arith.constant 0 : index
      %c0_41 = arith.constant 0 : index
      %65 = vector.load %arg9[%c0_40, %c0_41] : memref<8x1xf32, #tpu.memory_space<vmem>>, vector<8x1xf32>
      tpu.vector_store %arg9[%c0_40, %c0_41], %64 {strides = array<i32>} : memref<8x1xf32, #tpu.memory_space<vmem>>, vector<8x1xf32>,
    } else {
    }
    %c0 = arith.constant 0 : index
    %c0_1 = arith.constant 0 : index
    %3 = vector.load %arg2[%c0, %c0_1] : memref<8x128xbf16, #tpu.memory_space<vmem>>, vector<8x128xbf16>
    %c0_2 = arith.constant 0 : index
    %c0_3 = arith.constant 0 : index
    %4 = vector.load %arg3[%c0_2, %c0_3] : memref<512x128xbf16, #tpu.memory_space<vmem>>, vector<512x128xbf16>
    %cst = arith.constant dense<0.000000e+00> : vector<8x512xf32>
    %5 = tpu.matmul %3, %4, %cst {dimension_numbers = #tpu.dot_dimension_numbers<[1], [1], [0], [0], [0, 0, 1, 0], [], []>} : vector<8x128xbf16>, vector<512x128xbf16>, vector<8x512xf32> -> vector<8x512xf32>
    %cst_4 = arith.constant 14.2857141 : f32
    %6 = vector.broadcast %cst_4 : f32 to vector<8x512xf32>
    %7 = arith.mulf %5, %6 : vector<8x512xf32>
    %8 = tpu.iota {dimensions = array<i32: 0>} : vector<8x512xi32>
    %c8_i32 = arith.constant 8 : i32
    %9 = arith.muli %arg0, %c8_i32 : i32
    %10 = vector.broadcast %9 : i32 to vector<8x512xi32>
    %11 = arith.addi %8, %10 : vector<8x512xi32>
    %12 = tpu.iota {dimensions = array<i32: 1>} : vector<8x512xi32>
    %c512_i32 = arith.constant 512 : i32
    %13 = arith.muli %arg1, %c512_i32 : i32
    %14 = vector.broadcast %13 : i32 to vector<8x512xi32>
    %15 = arith.addi %12, %14 : vector<8x512xi32>
    %c1000_i32 = arith.constant 1000 : i32
    %16 = vector.broadcast %c1000_i32 : i32 to vector<8x512xi32>
    %17 = arith.cmpi slt, %15, %16 : vector<8x512xi32>
    %18 = arith.cmpi ne, %11, %15 : vector<8x512xi32>
    %19 = arith.andi %17, %18 : vector<8x512xi1>
    %20 = arith.extui %19 : vector<8x512xi1> to vector<8x512xi32>
    %21 = arith.sitofp %20 : vector<8x512xi32> to vector<8x512xf32>
    %cst_5 = arith.constant -1.000000e+30 : f32
    %22 = vector.broadcast %cst_5 : f32 to vector<8x512xf32>
    %23 = arith.select %17, %7, %22 : vector<8x512xi1>, vector<8x512xf32>
    %cst_6 = arith.constant dense<0xFF800000> : vector<8xf32>
    %24 = vector.multi_reduction <maximumf>, %23, %cst_6 [1] : vector<8x512xf32> to vector<8xf32>
    %25 = vector.shape_cast %24 : vector<8xf32> to vector<8x1xf32>
    %c0_7 = arith.constant 0 : index
    %c0_8 = arith.constant 0 : index
    %26 = vector.load %arg6[%c0_7, %c0_8] : memref<8x1xf32, #tpu.memory_space<vmem>>, vector<8x1xf32>
    %27 = arith.maximumf %26, %25 : vector<8x1xf32>
    %cst_9 = arith.constant -1.000000e+30 : f32
    %28 = vector.broadcast %cst_9 : f32 to vector<8x512xf32>
    %29 = arith.select %19, %7, %28 : vector<8x512xi1>, vector<8x512xf32>
    %30 = vector.broadcast %27 : vector<8x1xf32> to vector<8x512xf32>
    %31 = arith.subf %29, %30 : vector<8x512xf32>
    %32 = math.exp %31 : vector<8x512xf32>
    %cst_10 = arith.constant dense<0.000000e+00> : vector<8xf32>
    %33 = vector.multi_reduction <add>, %32, %cst_10 [1] : vector<8x512xf32> to vector<8xf32>
    %34 = vector.shape_cast %33 : vector<8xf32> to vector<8x1xf32>
    %c0_11 = arith.constant 0 : index
    %c0_12 = arith.constant 0 : index
    %35 = vector.load %arg7[%c0_11, %c0_12] : memref<8x1xf32, #tpu.memory_space<vmem>>, vector<8x1xf32>
    %36 = arith.subf %26, %27 : vector<8x1xf32>
    %37 = math.exp %36 : vector<8x1xf32>
    %38 = arith.mulf %35, %37 : vector<8x1xf32>
    %39 = arith.addf %38, %34 : vector<8x1xf32>
    %c0_13 = arith.constant 0 : index
    %c0_14 = arith.constant 0 : index
    %40 = vector.load %arg7[%c0_13, %c0_14] : memref<8x1xf32, #tpu.memory_space<vmem>>, vector<8x1xf32>
    tpu.vector_store %arg7[%c0_13, %c0_14], %39 {strides = array<i32>} : memref<8x1xf32, #tpu.memory_space<vmem>>, vector<8x1xf32>,
    %c0_15 = arith.constant 0 : index
    %c0_16 = arith.constant 0 : index
    %41 = vector.load %arg6[%c0_15, %c0_16] : memref<8x1xf32, #tpu.memory_space<vmem>>, vector<8x1xf32>
    tpu.vector_store %arg6[%c0_15, %c0_16], %27 {strides = array<i32>} : memref<8x1xf32, #tpu.memory_space<vmem>>, vector<8x1xf32>,
    %c0_17 = arith.constant 0 : index
    %c0_18 = arith.constant 0 : index
    %42 = vector.load %arg4[%c0_17, %c0_18] : memref<8x512xf32, #tpu.memory_space<vmem>>, vector<8x512xf32>
    %43 = arith.mulf %42, %21 : vector<8x512xf32>
    %c0_19 = arith.constant 0 : index
    %c0_20 = arith.constant 0 : index
    %44 = vector.load %arg8[%c0_19, %c0_20] : memref<8x1xf32, #tpu.memory_space<vmem>>, vector<8x1xf32>
    %cst_21 = arith.constant dense<0.000000e+00> : vector<8xf32>
    %45 = vector.multi_reduction <add>, %43, %cst_21 [1] : vector<8x512xf32> to vector<8xf32>
    %46 = vector.shape_cast %45 : vector<8xf32> to vector<8x1xf32>
    %47 = arith.addf %44, %46 : vector<8x1xf32>
    %c0_22 = arith.constant 0 : index
    %c0_23 = arith.constant 0 : index
    %48 = vector.load %arg8[%c0_22, %c0_23] : memref<8x1xf32, #tpu.memory_space<vmem>>, vector<8x1xf32>
    tpu.vector_store %arg8[%c0_22, %c0_23], %47 {strides = array<i32>} : memref<8x1xf32, #tpu.memory_space<vmem>>, vector<8x1xf32>,
    %c0_24 = arith.constant 0 : index
    %c0_25 = arith.constant 0 : index
    %49 = vector.load %arg9[%c0_24, %c0_25] : memref<8x1xf32, #tpu.memory_space<vmem>>, vector<8x1xf32>
    %50 = arith.mulf %43, %7 : vector<8x512xf32>
    %cst_26 = arith.constant dense<0.000000e+00> : vector<8xf32>
    %51 = vector.multi_reduction <add>, %50, %cst_26 [1] : vector<8x512xf32> to vector<8xf32>
    %52 = vector.shape_cast %51 : vector<8xf32> to vector<8x1xf32>
    %53 = arith.addf %49, %52 : vector<8x1xf32>
    %c0_27 = arith.constant 0 : index
    %c0_28 = arith.constant 0 : index
    %54 = vector.load %arg9[%c0_27, %c0_28] : memref<8x1xf32, #tpu.memory_space<vmem>>, vector<8x1xf32>
    tpu.vector_store %arg9[%c0_27, %c0_28], %53 {strides = array<i32>} : memref<8x1xf32, #tpu.memory_space<vmem>>, vector<8x1xf32>,
    %c1_i32 = arith.constant 1 : i32
    %55 = arith.cmpi eq, %arg1, %c1_i32 : i32
    %56 = arith.extui %55 : i1 to i32
    %c0_i32_29 = arith.constant 0 : i32
    %57 = arith.cmpi ne, %56, %c0_i32_29 : i32
    scf.if %57 {
      %c0_30 = arith.constant 0 : index
      %c0_31 = arith.constant 0 : index
      %58 = vector.load %arg8[%c0_30, %c0_31] : memref<8x1xf32, #tpu.memory_space<vmem>>, vector<8x1xf32>
      %c0_32 = arith.constant 0 : index
      %c0_33 = arith.constant 0 : index
      %59 = vector.load %arg7[%c0_32, %c0_33] : memref<8x1xf32, #tpu.memory_space<vmem>>, vector<8x1xf32>
      %cst_34 = arith.constant 9.99999996E-13 : f32
      %60 = vector.broadcast %cst_34 : f32 to vector<8x1xf32>
      %61 = arith.addf %59, %60 : vector<8x1xf32>
      %62 = math.log %61 : vector<8x1xf32>
      %c0_35 = arith.constant 0 : index
      %c0_36 = arith.constant 0 : index
      %63 = vector.load %arg9[%c0_35, %c0_36] : memref<8x1xf32, #tpu.memory_space<vmem>>, vector<8x1xf32>
      %c0_37 = arith.constant 0 : index
      %c0_38 = arith.constant 0 : index
      %64 = vector.load %arg6[%c0_37, %c0_38] : memref<8x1xf32, #tpu.memory_space<vmem>>, vector<8x1xf32>
      %65 = arith.addf %64, %62 : vector<8x1xf32>
      %66 = arith.mulf %58, %65 : vector<8x1xf32>
      %67 = arith.subf %63, %66 : vector<8x1xf32>
      %68 = tpu.reciprocal %58 {approx = true} : vector<8x1xf32> -> vector<8x1xf32>
      %69 = arith.mulf %67, %68 : vector<8x1xf32>
      %cst_39 = arith.constant -1.250000e-01 : f32
      %70 = vector.broadcast %cst_39 : f32 to vector<8x1xf32>
      %71 = arith.mulf %70, %69 : vector<8x1xf32>
      %72 = tpu.iota {dimensions = array<i32: 0>} : vector<8x1xi32>
      %c8_i32_40 = arith.constant 8 : i32
      %73 = arith.muli %arg0, %c8_i32_40 : i32
      %74 = vector.broadcast %73 : i32 to vector<8x1xi32>
      %75 = arith.addi %72, %74 : vector<8x1xi32>
      %c8_i32_41 = arith.constant 8 : i32
      %76 = vector.broadcast %c8_i32_41 : i32 to vector<8x1xi32>
      %77 = arith.cmpi slt, %75, %76 : vector<8x1xi32>
      %cst_42 = arith.constant 0.000000e+00 : f32
      %78 = vector.broadcast %cst_42 : f32 to vector<8x1xf32>
      %79 = arith.select %77, %71, %78 : vector<8x1xi1>, vector<8x1xf32>
      %c0_43 = arith.constant 0 : index
      %c0_44 = arith.constant 0 : index
      %80 = vector.load %arg5[%c0_43, %c0_44] : memref<8x1xf32, #tpu.memory_space<vmem>>, vector<8x1xf32>
      tpu.vector_store %arg5[%c0_43, %c0_44], %79 {strides = array<i32>} : memref<8x1xf32, #tpu.memory_space<vmem>>, vector<8x1xf32>,
    } else {
    }
    return
  }
  func.func @transform_0(%arg0: i32, %arg1: i32) -> (i32, i32) {
    %c0_i32 = arith.constant 0 : i32
    %c0_i32_0 = arith.constant 0 : i32
    return %arg0, %c0_i32 : i32, i32
  }
  func.func @transform_1(%arg0: i32, %arg1: i32) -> (i32, i32) {
    %c0_i32 = arith.constant 0 : i32
    %c0_i32_0 = arith.constant 0 : i32
    return %arg1, %c0_i32 : i32, i32
  }
  func.func @transform_2(%arg0: i32, %arg1: i32) -> (i32, i32) {
    %c0_i32 = arith.constant 0 : i32
    return %arg0, %arg1 : i32, i32
  }
  func.func @transform_3(%arg0: i32, %arg1: i32) -> (i32, i32) {
    %c0_i32 = arith.constant 0 : i32
    %c0_i32_0 = arith.constant 0 : i32
    return %arg0, %c0_i32 : i32, i32
  }
}

</mosaic_0001>

<bundles_post_ra>
// kernel: tpu_custom_call.1
= control target key start
LH: loop header
LB: loop body
LE: loop exit
PB: predicated region body
PF: predicated region fallthrough
CT: control target
= control target key end

     0   :  { %8 = vsyncpa [#allocation7], 0  ;;  %s1531_s0 = inlined_call_operand.hbm [shape: bf16[8,128], index: 0, kind: input, shape index: {}]   ;;  %s1532_s1 = inlined_call_operand.hbm [shape: bf16[1024,128], index: 1, kind: input, shape index: {}]   ;;  %s1533_s2 = inlined_call_operand.hbm [shape: f32[8,1024], index: 2, kind: input, shape index: {}]   ;;  %s1534_s3 = inlined_call_operand.vmem [shape: f32[8,1], index: 3, kind: output, shape index: {}]  }
   0x1   :  { %9 = vsyncpa [#allocation9], 0 }
   0x2   :  { %11 = vsyncpa [#allocation9 + $0x1], 0  ;;  %s1243_s12 = smov 0   ;;  %s1245_s13 = smov 0  }
   0x3   :  { %s1247_s14 = smov 0   ;;  %s1249_s15 = smov 0  }
   0x4   :  { %s1251_s16 = smov 0   ;;  %s1253_s17 = smov 0  }
   0x5 LB: > { %s26_s18 = sadd.s32 1, %s1208_s16  ;;  %s62_s19 = sadd.s32 1, %s1200_s14  ;;  %s1212_s17 = sphi %s1253_s17, %s17_s17   ;;  %s1208_s16 = sphi %s1251_s16, %s1565_s16   ;;  %s1204_s15 = sphi %s1249_s15, %s1564_s15   ;;  %s1200_s14 = sphi %s1247_s14, %s1563_s14   ;;  %s1196_s13 = sphi %s1245_s13, %s1562_s13   ;;  %s1192_s12 = sphi %s1243_s12, %s1561_s12  }
   0x6   : > { %p27_p0 = scmp.ge.s32.totalorder %s26_s18, 2  ;;  %p69_p1 = scmp.ne.s32.totalorder %s1200_s14, %s1196_s13 }
   0x7   : > { %p70_p2 = scmp.eq.s32.totalorder %s1212_s17, 0  ;;  %p966_p4 = scmp.lt.s32.totalorder %s1212_s17, 2 }
   0x8   : > { %s1567_s18 = smov (%p27_p0, %s26_s18), 0  ;;  %s166_s21 = sand.u32 1, %s1212_s17  }
   0x9   : > { %p71_p3 = por %p70_p2, %p69_p1  ;;  %s59_s20 = ssub.s32 %s1208_s16, %s1567_s18 }
   0xa   : > { %p60_p5 = scmp.eq.s32.totalorder %s59_s20, 0  ;;  %s168_s22 = sand.u32 1, %s1200_s14  }
   0xb   : > { %s908_s23 = sshll.u32 %s1208_s16, 12  ;;  %s856_s25 = sshll.u32 %s168_s22, 8 }
   0xc   : > { %s1287_s24 = scalar_select %p60_p5, %s1200_s14, %s62_s19  }
   0xd   : > { %s1294_s28 = scalar_lea.hbm %s1532_s1, %s908_s23  ;;  %p1296_p6 = pnand %p966_p4, %p71_p3 }
   0xe   : > { %s170_s30 = scalar_lea.vmem [#allocation8], %s856_s25  ;;  %s1302_s5 = scalar_lea.sflag [#allocation9], %s166_s21 }
   0xf   : > { %s1542_s29 = scalar_select %p1296_p6, 1, 0 }
  0x10   : > { %s177_s4 = sshll.u32 %s170_s30, 4  ;;  %s1070_s6 = scalar_lea.hbm %s1294_s28, 4096  ;;  %s1300_s4 = int_to_ptr.vmem [resolvable:$true] %s177_s4 }
  0x11   : > { %p1071_p7 = scmp.ne.s32.totalorder %s1294_s28, %s1070_s6  ;;  %p1535_p8 = pneg %p1296_p6 }
  0x12   : > { %s1075_s9 = scalar_lea.hbm %s1532_s1, 8192  ;;  %p1076_p11 = scmp.lt.u32.totalorder %s1294_s28, %s1532_s1 }
  0x13   : > { %p1073_p9 = pnand %p1535_p8, %p1071_p7  ;;  %p1077_p12 = scmp.lt.u32.totalorder %s1075_s9, %s1070_s6 }
  0x14   : > { %p1079_p0 = scmp.lt.u32.totalorder %s1070_s6, %s1294_s28 }
  0x15   : > { %p1074_p10 = pneg %p1073_p9  ;;  %p1078_p13 = por %p1077_p12, %p1076_p11 }
  0x17   : > { %p1080_p1 = por %p1079_p0, %p1078_p13 }
  0x19   : > { %p1081_p2 = pnand %p1080_p1, %p1074_p10 }
  0x1b   : > { %1084 = shalt.err (!%p1081_p2)
}
  0x1c   : > { %s1085_s19 = scalar_lea.vmem %s1300_s4, 4096  ;;  %s1214_s20 = smov [#allocation8]  }
  0x1d   : > { %p1086_p3 = scmp.ne.s32.totalorder %s1300_s4, %s1085_s19  ;;  %s1090_s21 = sshll.u32 %s1214_s20, 4  ;;  %s1091_s21 = int_to_ptr.vmem [resolvable:$false] %s1090_s21 }
  0x1e   : > { %s1092_s23 = scalar_lea.vmem %s1091_s21, 8192  ;;  %p1093_p7 = scmp.lt.s32.totalorder %s1300_s4, %s1091_s21 }
  0x1f   : > { %p1088_p4 = pnand %p1086_p3, %p1535_p8  ;;  %p1094_p9 = scmp.lt.s32.totalorder %s1092_s23, %s1085_s19 }
  0x21   : > { %p1089_p5 = pneg %p1088_p4  ;;  %p1095_p11 = por %p1094_p9, %p1093_p7 }
  0x23   : > { %p1096_p12 = pnand %p1095_p11, %p1089_p5 }
  0x25   : > { %1099 = shalt.err (!%p1096_p12)
}
  0x26   : > { %s1215_s25 = smov 64   ;;  %s1216_s26 = smov 4  }
  0x27   : > { %961 = dma.hbm_to_vmem [thread:$0]  (!%p1296_p6), %s1294_s28, 4096, %s1300_s4, %s1302_s5, %s1215_s25, %s1215_s25, %s1216_s26  }
  0x28   : > { %s852_s27 = sadd.s32 4294967295, %s1212_s17   ;;  %p75_p10 = scmp.ne.s32.totalorder %s1196_s13, %s1192_s12 }
  0x29   : > { %p1335_p13 = scmp.eq.s32.totalorder %s852_s27, 0  ;;  %p853_p0 = scmp.ge.s32.totalorder %s1212_s17, 1 }
  0x2a   : > { %p140_p1 = scmp.lt.s32.totalorder %s1212_s17, 3  ;;  %s1217_s12 = smov [#allocation6]  }
  0x2b   : > { %s1543_s30 = scalar_select %p1335_p13, 1, 0 }
  0x2c   : > { %p1343_p2 = por %p1335_p13, %p75_p10  ;;  %p1347_p3 = pnand %p853_p0, %p140_p1 }
  0x2d   : > { %s155_s28 = sshll.u32 %s1217_s12, 4  ;;  %s859_s4 = sshll.u32 %s168_s22, 5  ;;  %s156_s28 = int_to_ptr.vmem [resolvable:$true] %s155_s28 }
  0x2e   : > { %s1544_s6 = scalar_select %p1343_p2, 1, 0 }
  0x2f   : > { %s1545_s7 = scalar_select %p1347_p3, 1, 0 }
  0x30   : > { %p954_p4 = pneg %p1347_p3  ;;  %s909_s8 = sshll.u32 %s1208_s16, 9 }
  0x31   : > { %s1365_s19 = scalar_lea.hbm %s1533_s2, %s909_s8  ;;  %s191_s20 = scalar_lea.vmem [#allocation10], %s859_s4 }
  0x32   : > { %p1358_p5 = pnand %p954_p4, %p1335_p13  ;;  %s201_s21 = sshll.u32 %s191_s20, 4  ;;  %s1367_s21 = int_to_ptr.vmem [resolvable:$true] %s201_s21 }
  0x33   : > { %s1100_s25 = scalar_lea.hbm %s1531_s0, 64 }
  0x34   : > { %p1101_p7 = scmp.ne.s32.totalorder %s1531_s0, %s1100_s25  ;;  %p1102_p9 = pneg %p1358_p5 }
  0x35   : > { %p1107_p10 = scmp.lt.u32.totalorder %s1100_s25, %s1531_s0 }
  0x36   : > { %p1103_p11 = pnand %p1102_p9, %p1101_p7 }
  0x38   : > { %p1104_p12 = pneg %p1103_p11 }
  0x3a   : > { %p1109_p0 = pnand %p1107_p10, %p1104_p12 }
  0x3c   : > { %1112 = shalt.err (!%p1109_p0)
}
  0x3d   : > { %s1113_s4 = scalar_lea.vmem %s156_s28, 64  ;;  %p1121_p2 = scmp.lt.s32.totalorder %s156_s28, %s156_s28 }
  0x3e   : > { %p1114_p1 = scmp.ne.s32.totalorder %s156_s28, %s1113_s4  ;;  %p1122_p13 = scmp.lt.s32.totalorder %s1113_s4, %s1113_s4 }
  0x40   : > { %p1116_p4 = pnand %p1114_p1, %p1102_p9  ;;  %p1123_p3 = por %p1122_p13, %p1121_p2 }
  0x42   : > { %p1117_p8 = pneg %p1116_p4 }
  0x44   : > { %p1124_p6 = pnand %p1123_p3, %p1117_p8 }
  0x46   : > { %1127 = shalt.err (!%p1124_p6)
}
  0x47   : > { %957 = dma.hbm_to_vmem [thread:$0]  (!%p1358_p5), %s1531_s0, 64, %s156_s28, [#allocation7]  }
  0x48   : > { %s1128_s22 = scalar_lea.hbm %s1365_s19, 512  ;;  %p1547_p9 = scmp.ne.s32.totalorder %s1542_s29, 0 }
  0x49   : > { %p1129_p7 = scmp.ne.s32.totalorder %s1365_s19, %s1128_s22  ;;  %s1133_s26 = scalar_lea.hbm %s1533_s2, 1024 }
  0x4a   : > { %p1548_p11 = pneg %p1547_p9  ;;  %p1134_p6 = scmp.lt.u32.totalorder %s1365_s19, %s1533_s2 }
  0x4b   : > { %p1135_p8 = scmp.lt.u32.totalorder %s1133_s26, %s1128_s22  ;;  %p1137_p2 = scmp.lt.u32.totalorder %s1128_s22, %s1365_s19 }
  0x4c   : > { %p1131_p12 = pnand %p1129_p7, %p1548_p11 }
  0x4d   : > { %p1136_p13 = por %p1135_p8, %p1134_p6 }
  0x4e   : > { %p1132_p10 = pneg %p1131_p12 }
  0x4f   : > { %p1138_p3 = por %p1137_p2, %p1136_p13 }
  0x51   : > { %p1139_p0 = pnand %p1138_p3, %p1132_p10 }
  0x53   : > { %1142 = shalt.err (!%p1139_p0)
}
  0x54   : > { %s1143_s28 = scalar_lea.vmem %s1367_s21, 512  ;;  %p1549_p1 = pmov %p1548_p11 }
  0x55   : > { %p1144_p5 = scmp.ne.s32.totalorder %s1367_s21, %s1143_s28  ;;  %s1218_s10 = smov [#allocation10]  }
  0x56   : > { %s1148_s11 = sshll.u32 %s1218_s10, 4  ;;  %s1149_s11 = int_to_ptr.vmem [resolvable:$false] %s1148_s11 }
  0x57   : > { %p1146_p4 = pnand %p1144_p5, %p1549_p1  ;;  %s1150_s4 = scalar_lea.vmem %s1149_s11, 1024 }
  0x58   : > { %p1151_p11 = scmp.lt.s32.totalorder %s1367_s21, %s1149_s11  ;;  %p1152_p12 = scmp.lt.s32.totalorder %s1150_s4, %s1143_s28 }
  0x59   : > { %p1147_p7 = pneg %p1146_p4 }
  0x5a   : > { %p1153_p6 = por %p1152_p12, %p1151_p11 }
  0x5c   : > { %p1154_p8 = pnand %p1153_p6, %p1147_p7 }
  0x5e   : > { %1157 = shalt.err (!%p1154_p8)
}
  0x5f   : > { %964 = dma.hbm_to_vmem [thread:$0]  (!%p1547_p9), %s1365_s19, 512, %s1367_s21, %s1302_s5  }
  0x60   : > { %p1550_p10 = scmp.ne.s32.totalorder %s1545_s7, 0 }
  0x61   : > { %p1551_p13 = scmp.ne.s32.totalorder (!%p1550_p10), %s1543_s30, 0 }
  0x62   : > { %210 = sbr.rel (%p1550_p10) target bundleno = 879 (0x36f), region = 32 }
  0x69   : > { %1183 = dma.done.wait (%p1551_p13), [#allocation7], 64  }
  0x6a   : > { %1185 = vsyncadd (%p1551_p13), [#allocation7], 4294967232  ;;  %s216_s8 = sand.u32 1, %s852_s27   ;;  %s218_s20 = sand.u32 1, %s1196_s13  }
  0x6b   : > { %s864_s29 = sshll.u32 %s218_s20, 8  ;;  %s217_s22 = scalar_lea.sflag [#allocation9], %s216_s8 }
  0x6c   : > { %s1418_s23 = scalar_lea.vmem [#allocation8], %s864_s29  ;;  %p1552_p9 = scmp.ne.s32.totalorder %s1544_s6, 0 }
  0x6e   : > { %1187 = dma.done.wait (%p1552_p9), %s217_s22, 4608  }
  0x6f   : > { %1189 = vsyncadd (%p1552_p9), %s217_s22, 4294962688  ;;  %s865_s5 = sshll.u32 %s218_s20, 5  ;;  %p866_p2 = scmp.ne.s32.totalorder %s1204_s15, 0 }
  0x70   : > { %s1424_s7 = scalar_lea.vmem [#allocation10], %s865_s5  ;;  %vm267_vm0 = vcmask (!%p866_p2), 7168   ;;  %v1219_v0 = vmov (!%p866_p2), -1e+30   ;;  %v1220_v1 = vmov (!%p866_p2), 0.0  }
  0x71   : > { %266 = sbr.rel (%p866_p2) target bundleno = 120 (0x78), region = 48  ;;  %268 = vst.msk [vmem:[#allocation2] sm:$0xff] (!%p866_p2), %vm267_vm0, %v1219_v0  ;;  %269 = vst.msk [vmem:[#allocation3] sm:$0xff] (!%p866_p2), %vm267_vm0, %v1220_v1 }
  0x72   : > { %270 = vst.msk [vmem:[#allocation4] sm:$0xff] (!%p866_p2), %vm267_vm0, %v1220_v1  ;;  %271 = vst.msk [vmem:[#allocation5] sm:$0xff] (!%p866_p2), %vm267_vm0, %v1220_v1 }
  0x78 PF: > { %v1024_v2 = vld [vmem:[%s1418_s23 + $0x40] sm:$0xff]   ;;  %v1028_v6 = vld [vmem:[%s1418_s23 + $0x48] sm:$0xff]   ;;  %v1032_v10 = vld [vmem:[%s1418_s23 + $0x50] sm:$0xff]   ;;  %v615_v35 = vlaneseq  ;;  %s899_s27 = sshll.u32 %s1204_s15, 9  ;;  %v1221_v48 = vmov 0.0   ;;  %vm694_vm13 = vcmask 7168  }
  0x79   : > { %v1025_v3 = vld [vmem:[%s1418_s23 + $0xc0] sm:$0xff]   ;;  %910 = vmatprep.subr.bf16.mxu0 %v1024_v2  ;;  %v1029_v7 = vld [vmem:[%s1418_s23 + $0xc8] sm:$0xff]   ;;  %v1033_v11 = vld [vmem:[%s1418_s23 + $0xd0] sm:$0xff]   ;;  %v626_v40 = vstv %s899_s27  ;;  %p904_p3 = scmp.ne.s32.totalorder %s1204_s15, 1 }
  0x7a   : > { %v1026_v4 = vld [vmem:[%s1418_s23] sm:$0xff]   ;;  %928 = vmatprep.subr.bf16.mxu1 %v1025_v3  ;;  %v1030_v8 = vld [vmem:[%s1418_s23 + $0x8] sm:$0xff]   ;;  %v1034_v12 = vld [vmem:[%s1418_s23 + $0x10] sm:$0xff]   ;;  %v621_v36 = vand.u32 127, %v615_v35  ;;  %v616_v41 = vshrl.u32 %v615_v35, 7 }
  0x7b   : > { %v1027_v5 = vld [vmem:[%s1418_s23 + $0x80] sm:$0xff]   ;;  %911 = vmatpush3.bf16.xpose.msra.mxu0 %v1026_v4  ;;  %v1031_v9 = vld [vmem:[%s1418_s23 + $0x88] sm:$0xff]   ;;  %v1035_v13 = vld [vmem:[%s1418_s23 + $0x90] sm:$0xff]  }
  0x7c   : > { %929 = vmatpush3.bf16.xpose.msra.mxu1 %v1027_v5  ;;  %912 = vmatprep.subr.bf16.mxu0 %v1028_v6  ;;  %v1036_v14 = vld [vmem:[%s1418_s23 + $0x58] sm:$0xff]   ;;  %v1040_v18 = vld [vmem:[%s1418_s23 + $0x60] sm:$0xff]   ;;  %v1044_v23 = vld [vmem:[%s1418_s23 + $0x68] sm:$0xff]   ;;  %v623_v37 = vadd.s32 256, %v621_v36  ;;  %v622_v38 = vadd.s32 128, %v621_v36  ;;  %v624_v39 = vadd.s32 384, %v621_v36  ;;  %v627_v42 = vadd.s32 %v626_v40, %v621_v36 }
  0x7d   : > { %930 = vmatprep.subr.bf16.mxu1 %v1029_v7  ;;  %v1037_v15 = vld [vmem:[%s1418_s23 + $0xd8] sm:$0xff]   ;;  %v1041_v19 = vld [vmem:[%s1418_s23 + $0xe0] sm:$0xff]   ;;  %v1045_v24 = vld [vmem:[%s1418_s23 + $0xe8] sm:$0xff]  }
  0x7e   : > { %v1038_v16 = vld [vmem:[%s1418_s23 + $0x18] sm:$0xff]   ;;  %v1042_v20 = vld [vmem:[%s1418_s23 + $0x20] sm:$0xff]   ;;  %v1046_v25 = vld [vmem:[%s1418_s23 + $0x28] sm:$0xff]   ;;  %v629_v43 = vadd.s32 %v626_v40, %v623_v37  ;;  %v628_v44 = vadd.s32 %v626_v40, %v622_v38  ;;  %v630_v45 = vadd.s32 %v626_v40, %v624_v39  ;;  %vm635_vm1 = vcmp.ne.s32.totalorder %v616_v41, %v627_v42 }
  0x7f   : > { %v1039_v17 = vld [vmem:[%s1418_s23 + $0x98] sm:$0xff]   ;;  %v1043_v22 = vld [vmem:[%s1418_s23 + $0xa0] sm:$0xff]   ;;  %v1047_v26 = vld [vmem:[%s1418_s23 + $0xa8] sm:$0xff]   ;;  %vm631_vm5 = vcmp.lt.s32.totalorder %v627_v42, 1000 }
  0x80   : > { %v272_v21 = vld [vmem:[#allocation6] sm:$0xf]  ;;  %v1048_v27 = vld [vmem:[%s1418_s23 + $0x70] sm:$0xff]   ;;  %vm637_vm2 = vcmp.ne.s32.totalorder %v616_v41, %v629_v43  ;;  %vm636_vm3 = vcmp.ne.s32.totalorder %v616_v41, %v628_v44  ;;  %vm638_vm4 = vcmp.ne.s32.totalorder %v616_v41, %v630_v45  ;;  %vm632_vm6 = vcmp.lt.s32.totalorder %v628_v44, 1000  ;;  %vm1461_vm7 = vmand %vm631_vm5, %vm635_vm1 }
  0x81   : > { %926 = vmatprep.mubr.bf16.mxu0 %v272_v21  ;;  %944 = vmatprep.mubr.bf16.mxu1 %v272_v21  ;;  %v1049_v28 = vld [vmem:[%s1418_s23 + $0xf0] sm:$0xff]   ;;  %v1052_v31 = vld [vmem:[%s1418_s23 + $0x78] sm:$0xff]   ;;  %vm633_vm8 = vcmp.lt.s32.totalorder %v629_v43, 1000  ;;  %vm1466_vm9 = vmand %vm632_vm6, %vm636_vm3  ;;  %vm634_vm10 = vcmp.lt.s32.totalorder %v630_v45, 1000  ;;  %v900_v49 = vsel %vm1461_vm7, 1.0, %v1221_v48 }
  0x82   : > { %v1050_v29 = vld [vmem:[%s1418_s23 + $0x30] sm:$0xff]   ;;  %v1053_v32 = vld [vmem:[%s1418_s23 + $0xf8] sm:$0xff]   ;;  %v697_v50 = vld [vmem:[%s1424_s7] sm:$0xff]  ;;  %v901_v52 = vsel %vm1466_vm9, 1.0, %v1221_v48 }
  0x83   : > { %913 = vmatpush3.bf16.xpose.msra.mxu0 %v1030_v8  ;;  %v1051_v30 = vld [vmem:[%s1418_s23 + $0xb0] sm:$0xff]   ;;  %v1054_v33 = vld [vmem:[%s1418_s23 + $0x38] sm:$0xff]   ;;  %vm1474_vm11 = vmand %vm633_vm8, %vm637_vm2  ;;  %v701_v55 = vmul.f32 %v900_v49, %v697_v50 }
  0x84   : > { %931 = vmatpush3.bf16.xpose.msra.mxu1 %v1031_v9  ;;  %914 = vmatprep.subr.bf16.mxu0 %v1032_v10  ;;  %v1055_v34 = vld [vmem:[%s1418_s23 + $0xb8] sm:$0xff]   ;;  %v698_v53 = vld [vmem:[%s1424_s7 + $0x8] sm:$0xff]  ;;  %vm1482_vm12 = vmand %vm634_vm10, %vm638_vm4  ;;  %v902_v57 = vsel %vm1474_vm11, 1.0, %v1221_v48 }
  0x85   : > { %932 = vmatprep.subr.bf16.mxu1 %v1033_v11  ;;  %v699_v58 = vld [vmem:[%s1424_s7 + $0x10] sm:$0xff]  ;;  %v702_v59 = vmul.f32 %v901_v52, %v698_v53  ;;  %v903_v63 = vsel %vm1482_vm12, 1.0, %v1221_v48  ;;  %v700_v0 = vld [vmem:[%s1424_s7 + $0x18] sm:$0xff] }
  0x86   : > { %v703_v9 = vmul.f32 %v902_v57, %v699_v58  ;;  %v705_v53 = vld [vmem:[#allocation4] sm:$0xff]  ;;  %v688_v58 = vld [vmem:[#allocation3] sm:$0xff] }
  0x8b   : > { %915 = vmatpush3.bf16.xpose.msra.mxu0 %v1034_v12 }
  0x8c   : > { %933 = vmatpush3.bf16.xpose.msra.mxu1 %v1035_v13  ;;  %916 = vmatprep.subr.bf16.mxu0 %v1036_v14 }
  0x8d   : > { %934 = vmatprep.subr.bf16.mxu1 %v1037_v15 }
  0x93   : > { %917 = vmatpush3.bf16.xpose.msra.mxu0 %v1038_v16 }
  0x94   : > { %935 = vmatpush3.bf16.xpose.msra.mxu1 %v1039_v17  ;;  %918 = vmatprep.subr.bf16.mxu0 %v1040_v18  ;;  %v704_v17 = vmul.f32 %v903_v63, %v700_v0 }
  0x95   : > { %936 = vmatprep.subr.bf16.mxu1 %v1041_v19 }
  0x9b   : > { %919 = vmatpush3.bf16.xpose.msra.mxu0 %v1042_v20 }
  0x9c   : > { %937 = vmatpush3.bf16.xpose.msra.mxu1 %v1043_v22  ;;  %920 = vmatprep.subr.bf16.mxu0 %v1044_v23 }
  0x9d   : > { %938 = vmatprep.subr.bf16.mxu1 %v1045_v24 }
  0xa3   : > { %921 = vmatpush3.bf16.xpose.msra.mxu0 %v1046_v25  ;;  %v1222_v25 = vmov 0  }
  0xa4   : > { %939 = vmatpush3.bf16.xpose.msra.mxu1 %v1047_v26  ;;  %922 = vmatprep.subr.bf16.mxu0 %v1048_v27  ;;  %v660_v26 = vld [vmem:[#allocation2] sm:$0xff] }
  0xa5   : > { %940 = vmatprep.subr.bf16.mxu1 %v1049_v28  ;;  %1023 = vset.pattern.permute.xlu0 %v1222_v25 }
  0xab   : > { %923 = vmatpush3.bf16.xpose.msra.mxu0 %v1050_v29 }
  0xac   : > { %941 = vmatpush3.bf16.xpose.msra.mxu1 %v1051_v30  ;;  %924 = vmatprep.subr.bf16.mxu0 %v1052_v31  ;;  %v706_v30 = vadd.f32 %v702_v59, %v701_v55 }
  0xad   : > { %942 = vmatprep.subr.bf16.mxu1 %v1053_v32 }
  0xae   : > { %v707_v31 = vadd.f32 %v706_v30, %v703_v9 }
  0xb0   : > { %v708_v32 = vadd.f32 %v707_v31, %v704_v17 }
  0xb2   : > { %709 = vadd.xlane.f32.xlu1 %v708_v32 }
  0xb3   : > { %925 = vmatpush3.bf16.xpose.msra.mxu0 %v1054_v33 }
  0xb4   : > { %943 = vmatpush3.bf16.xpose.msra.mxu1 %v1055_v34 }
  0xba   : > { %927 = vmatmul.mubr.bf16.vlgmr.msra.gmra.mrb[0].mxu0 %v272_v21 }
  0xbb   : > { %945 = vmatmul.mubr.bf16.vlgmr.msra.gmra.mrb[0].mxu1 %v272_v21 }
 0x13f   : > { %v710_v54 = vpop.xlane.xlu1 %709 }
 0x18d   : > { %v563_v56 = vpop.f32.mrb[0].mxu0 }
 0x18e   : > { %v611_v60 = vmul.f32 14.285714, %v563_v56  ;;  %v604_v61 = vpop.f32.mrb[0].mxu1  ;;  %v565_v62 = vpop.f32.mrb[1].mxu0 }
 0x18f   : > { %v613_v1 = vmul.f32 14.285714, %v604_v61  ;;  %v612_v2 = vmul.f32 14.285714, %v565_v62  ;;  %v606_v3 = vpop.f32.mrb[1].mxu1  ;;  %v567_v4 = vpop.f32.mrb[2].mxu0 }
 0x190   : > { %v614_v5 = vmul.f32 14.285714, %v606_v3  ;;  %v608_v6 = vpop.f32.mrb[2].mxu1  ;;  %v568_v7 = vpop.f32.mrb[3].mxu0  ;;  %v651_v8 = vsel %vm631_vm5, %v611_v60, -1e+30  ;;  %v714_v10 = vmul.f32 %v701_v55, %v611_v60  ;;  %v711_v55 = vadd.f32 %v710_v54, %v705_v53 }
 0x191   : > { %v609_v11 = vpop.f32.mrb[3].mxu1  ;;  %v652_v12 = vsel %vm632_vm6, %v612_v2, -1e+30  ;;  %v653_v13 = vsel %vm633_vm8, %v613_v1, -1e+30  ;;  %v715_v14 = vmul.f32 %v702_v59, %v612_v2  ;;  %v716_v19 = vmul.f32 %v703_v9, %v613_v1  ;;  %v713_v62 = vld [vmem:[#allocation5] sm:$0xff] }
 0x192   : > { %v654_v15 = vsel %vm634_vm10, %v614_v5, -1e+30  ;;  %v655_v16 = vmax.f32 %v651_v8, %v652_v12  ;;  %v717_v22 = vmul.f32 %v704_v17, %v614_v5  ;;  %v662_v33 = vsel %vm1461_vm7, %v611_v60, -1e+30  ;;  %712 = vst.msk [vmem:[#allocation4] sm:$0xff] %vm694_vm13, %v711_v55 }
 0x193   : > { %v656_v18 = vmax.f32 %v653_v13, %v654_v15  ;;  %v718_v20 = vadd.f32 %v715_v14, %v714_v10  ;;  %v663_v34 = vsel %vm1466_vm9, %v612_v2, -1e+30  ;;  %v664_v35 = vsel %vm1474_vm11, %v613_v1, -1e+30 }
 0x194   : > { %v665_v37 = vsel %vm1482_vm12, %v614_v5, -1e+30 }
 0x195   : > { %v657_v21 = vmax.f32 %v655_v16, %v656_v18  ;;  %v719_v23 = vadd.f32 %v718_v20, %v716_v19 }
 0x197   : > { %658 = vmax.xlane.f32.xlu0 %v657_v21  ;;  %v720_v24 = vadd.f32 %v719_v23, %v717_v22 }
 0x199   : > { %v729_v3 = vld [vmem:[#allocation4] sm:$0xff] (!%p904_p3) }
 0x224   : > { %v659_v27 = vpop.xlane.xlu0 %658 }
 0x225   : > { %v661_v28 = vmax.f32 %v660_v26, %v659_v27 }
 0x227   : > { %v689_v29 = vsub.f32 %v660_v26, %v661_v28  ;;  %696 = vst.msk [vmem:[#allocation2] sm:$0xff] %vm694_vm13, %v661_v28  ;;  %668 = vperm.xlu0 %1023, %v661_v28  }
 0x229   : > { %v690_v56 = vmul.f32 1.442695, %v689_v29 }
 0x22e   : > { %v735_v5 = vld [vmem:[#allocation2] sm:$0xff] (!%p904_p3) }
 0x2a6   : > { %v669_v36 = vpop.permute.xlu0 %668 }
 0x2a7   : > { %v671_v38 = vsub.f32 %v662_v33, %v669_v36  ;;  %v672_v39 = vsub.f32 %v663_v34, %v669_v36  ;;  %v673_v40 = vsub.f32 %v664_v35, %v669_v36  ;;  %v674_v41 = vsub.f32 %v665_v37, %v669_v36 }
 0x2a9   : > { %v675_v42 = vmul.f32 1.442695, %v671_v38  ;;  %v677_v43 = vmul.f32 1.442695, %v672_v39  ;;  %v679_v44 = vmul.f32 1.442695, %v673_v40 }
 0x2aa   : > { %v681_v45 = vmul.f32 1.442695, %v674_v41 }
 0x2ab   : > { %1056 = vpow2.f32 %v675_v42 }
 0x2ac   : > { %1058 = vpow2.f32 %v677_v43 }
 0x2ad   : > { %1060 = vpow2.f32 %v679_v44 }
 0x2ae   : > { %1062 = vpow2.f32 %v681_v45 }
 0x2af   : > { %1064 = vpow2.f32 %v690_v56 }
 0x2b5   : > { %v1057_v46 = vpop.eup %1056 }
 0x2b6   : > { %v1059_v47 = vpop.eup %1058 }
 0x2b7   : > { %v683_v48 = vadd.f32 %v1059_v47, %v1057_v46  ;;  %v1061_v49 = vpop.eup %1060 }
 0x2b8   : > { %v1063_v51 = vpop.eup %1062 }
 0x2b9   : > { %v684_v50 = vadd.f32 %v1061_v49, %v683_v48  ;;  %v1065_v57 = vpop.eup %1064 }
 0x2ba   : > { %v692_v59 = vmul.f32 %v1065_v57, %v688_v58 }
 0x2bb   : > { %v685_v52 = vadd.f32 %v1063_v51, %v684_v50 }
 0x2bd   : > { %686 = vadd.xlane.f32.xlu1 %v685_v52 }
 0x2c1   : > { %721 = vadd.xlane.f32.xlu1 %v720_v24 }
 0x34a   : > { %v687_v60 = vpop.xlane.xlu1 %686 }
 0x34b   : > { %v693_v61 = vadd.f32 %v692_v59, %v687_v60  ;;  %728 = sbr.rel (%p904_p3) target bundleno = 879 (0x36f), region = 52 }
 0x34d   : > { %695 = vst.msk [vmem:[#allocation3] sm:$0xff] %vm694_vm13, %v693_v61 }
 0x34e   : > { %v722_v63 = vpop.xlane.xlu1 %721 }
 0x34f   : > { %v723_v0 = vadd.f32 %v722_v63, %v713_v62 }
 0x351   : > { %724 = vst.msk [vmem:[#allocation5] sm:$0xff] %vm694_vm13, %v723_v0 }
 0x354   : > { %v730_v1 = vld [vmem:[#allocation3] sm:$0xff] }
 0x355   : > { %v731_v2 = vadd.f32 1e-12, %v730_v1 }
 0x357   : > { %1066 = vlog2.f32 %v731_v2 }
 0x358   : > { %1068 = vrcp.f32 %v729_v3  ;;  %v734_v8 = vld [vmem:[#allocation5] sm:$0xff] }
 0x361   : > { %v1067_v4 = vpop.eup %1066 }
 0x362   : > { %v733_v6 = vmul.f32 0.6931472, %v1067_v4  ;;  %v1069_v10 = vpop.eup %1068 }
 0x364   : > { %v736_v7 = vadd.f32 %v735_v5, %v733_v6 }
 0x366   : > { %v737_v9 = vmul.f32 %v736_v7, %v729_v3 }
 0x368   : > { %v738_v11 = vsub.f32 %v734_v8, %v737_v9 }
 0x36a   : > { %v740_v12 = vmul.f32 %v1069_v10, %v738_v11 }
 0x36c   : > { %v741_v13 = vmul.f32 -0.125, %v740_v12 }
 0x36e   : > { %744 = vst.msk [vmem:[%s1534_s3] sm:$0xff] %vm694_vm13, %v741_v13 }
 0x36f PF: > { %s17_s17 = sadd.s32 1, %s1212_s17   ;;  %s1561_s12 = smov %s1196_s13 }
 0x370   : > { %p14_p0 = scmp.ge.s32.totalorder %s17_s17, 4   ;;  %s1562_s13 = smov %s1200_s14 }
 0x371   : > { %s1563_s14 = smov %s1287_s24  ;;  %s1564_s15 = smov %s1208_s16 }
 0x372   : > { %s1565_s16 = smov %s1567_s18  ;;  %16 = sbr.rel (!%p14_p0) target bundleno = 5 (0x5), region = 97 }
 0x379   :  { %764 = vsyncpa [#allocation7], 1 }
 0x37a   :  { %766 = vsyncpa [#allocation7 + $0x1], 1 }
 0x37b   :  { %767 = vsyncpa [#allocation9], 1 }
 0x37c   :  { %769 = vsyncpa [#allocation9 + $0x1], 1 }

</bundles_post_ra>
